<compile_context>
chip_gen: v5e
topology: v5e:2x2
jax: 0.10.0
libtpu: 0.0.40
codegen_flags: <defaults>
</compile_context>

<pallas_src>
import functools

import jax
import jax.numpy as jnp
from jax.experimental import pallas as pl
from jax.experimental.pallas import tpu as pltpu


def _round_up(x, m):
    return (x + m - 1) // m * m


def _resident_vmem_cap_bytes():
    """Generation-aware cap for vmem_limit_bytes (leave headroom below physical)."""
    try:
        kind = jax.devices()[0].device_kind.lower()
    except Exception:  # pragma: no cover - unknown backend: be conservative
        return 56 * 1024 * 1024
    if "v7" in kind or "7x" in kind:
        return 56 * 1024 * 1024      # 64 MiB/TC physical on v7x
    return 110 * 1024 * 1024         # 128 MiB physical on v5e / v6e


def _head_kernel(num_layers, out_pads, x_ref, *refs):
    """refs = (w0, ..., w_{L-1}, b_packed, out_ref).

    x_ref   : (TB, in0_pad)            bfloat16 (batch tile)
    w_i     : (in_i_pad, out_i_pad)    bfloat16, VMEM-resident across grid steps
    b_packed: (L, max_out_pad)         float32, VMEM-resident
    out_ref : (TB, out_{L-1}_pad)      bfloat16 (lane-dense, multiple of 128)
    """
    w_refs = refs[:num_layers]
    b_ref = refs[num_layers]
    out_ref = refs[num_layers + 1]

    h = x_ref[...]  # bf16 activations
    for i in range(num_layers):
        # MXU: bf16 x bf16 -> f32 accumulate.
        acc = jnp.dot(h.astype(jnp.bfloat16), w_refs[i][...],
                      preferred_element_type=jnp.float32)
        acc = acc + b_ref[i:i + 1, :out_pads[i]]   # f32 bias add (broadcast over batch)
        if i < num_layers - 1:
            acc = jnp.maximum(acc, 0.0)            # activation_fun == relu between layers
        h = acc
    out_ref[...] = h.astype(out_ref.dtype)


def prepare_head_params(weights, biases):
    """Pad & cast weights/biases ONCE (hoisted out of the per-call hot path).

    weights: list of [in_i, out_i] float matrices (x @ W + b layout)
    biases : list of [out_i] float vectors
    """
    num_layers = len(weights)
    in_pads = [_round_up(w.shape[0], 128) for w in weights]
    out_pads = [_round_up(w.shape[1], 128) for w in weights]
    for i in range(num_layers - 1):
        assert out_pads[i] == in_pads[i + 1], "chained layer dims must match"

    w_ops = []
    for w, ip, op in zip(weights, in_pads, out_pads):
        wp = jnp.zeros((ip, op), jnp.bfloat16)
        wp = wp.at[:w.shape[0], :w.shape[1]].set(w.astype(jnp.bfloat16))
        w_ops.append(wp)

    max_out = max(out_pads)
    b_pack = jnp.zeros((num_layers, max_out), jnp.float32)
    for i, b in enumerate(biases):
        b_pack = b_pack.at[i, :b.shape[0]].set(b.astype(jnp.float32))

    return dict(
        w_ops=tuple(w_ops),
        b_pack=b_pack,
        in_pads=tuple(in_pads),
        out_pads=tuple(out_pads),
        dim_in=int(weights[0].shape[0]),
        output_size=int(weights[-1].shape[1]),
        num_layers=num_layers,
    )


def n_feedforwards_head_logits(pooled, prepared, *, block_batch=256,
                               out_dtype=jnp.bfloat16):
    """Run the full MLP head in a single batch-tiled Pallas kernel.

    pooled  : [B, dim_emb] float array (encoder_outputs[1], i.e. pooled [CLS])
    prepared: output of prepare_head_params()
    returns : logits [B, output_size] in out_dtype
    """
    num_layers = prepared["num_layers"]
    w_ops = prepared["w_ops"]
    b_pack = prepared["b_pack"]
    in_pads = prepared["in_pads"]
    out_pads = prepared["out_pads"]
    dim_in = prepared["dim_in"]
    output_size = prepared["output_size"]

    B = pooled.shape[0]
    assert pooled.shape[1] == dim_in, "pooled dim must match first layer fan_in"

    # --- batch tiling: 16-aligned (bf16 sublane packing), >=2 tiles if possible ---
    b16 = _round_up(B, 16)
    tb = min(_round_up(block_batch, 16), b16)
    if b16 // tb < 2 and b16 >= 32:
        tb = _round_up(b16 // 2, 16)      # keep both v7x TensorCores busy
    b_pad = _round_up(B, tb)
    grid = (b_pad // tb,)

    # --- activation prep: only pad when shapes require it (weights are pre-padded) ---
    if b_pad == B and in_pads[0] == dim_in:
        x = pooled.astype(jnp.bfloat16)
    else:
        x = jnp.zeros((b_pad, in_pads[0]), jnp.bfloat16)
        x = x.at[:B, :dim_in].set(pooled.astype(jnp.bfloat16))

    out_itemsize = jnp.dtype(out_dtype).itemsize

    # --- cost estimate --------------------------------------------------------
    flops = 2 * b_pad * sum(ip * op for ip, op in zip(in_pads, out_pads))
    bytes_accessed = (int(x.size) * 2
                      + sum(int(wp.size) * 2 for wp in w_ops)
                      + int(b_pack.size) * 4
                      + b_pad * out_pads[-1] * out_itemsize)
    cost = pl.CostEstimate(flops=flops, transcendentals=0,
                           bytes_accessed=bytes_accessed)

    def _specs(single_buffer_resident):
        in_specs = [pl.BlockSpec((tb, in_pads[0]), lambda i: (i, 0))]   # batch-tiled x
        if single_buffer_resident:
            # Resident weights/biases: constant index_map, DMA'd once -> no need
            # to double-buffer them (halves their VMEM footprint).
            for wp in w_ops:
                in_specs.append(pl.BlockSpec(wp.shape, lambda i: (0, 0),
                                             pipeline_mode=pl.Buffered(1)))
            in_specs.append(pl.BlockSpec(b_pack.shape, lambda i: (0, 0),
                                         pipeline_mode=pl.Buffered(1)))
        else:
            for wp in w_ops:
                in_specs.append(pl.BlockSpec(wp.shape, lambda i: (0, 0)))
            in_specs.append(pl.BlockSpec(b_pack.shape, lambda i: (0, 0)))
        out_spec = pl.BlockSpec((tb, out_pads[-1]), lambda i: (i, 0))   # lane-dense logits
        return in_specs, out_spec

    def _vmem_limit(single_buffer_resident):
        res = 1 if single_buffer_resident else 2
        weight_bytes = res * sum(int(wp.size) * 2 for wp in w_ops)
        bias_bytes = res * int(b_pack.size) * 4
        io_bytes = 2 * tb * in_pads[0] * 2 + 2 * tb * out_pads[-1] * out_itemsize
        # Per-layer f32 accumulator + bf16 recast intermediates (not tracked by BlockSpecs).
        act_bytes = sum(tb * op * (4 + 2) for op in out_pads)
        need = io_bytes + weight_bytes + bias_bytes + act_bytes + (4 << 20)
        return int(min(_resident_vmem_cap_bytes(), max(16 << 20, need)))

    def _call(single_buffer_resident):
        in_specs, out_spec = _specs(single_buffer_resident)
        params = pltpu.CompilerParams(
            dimension_semantics=("parallel",),   # shard batch tiles across TCs on v7x
            vmem_limit_bytes=_vmem_limit(single_buffer_resident),
        )
        return pl.pallas_call(
            functools.partial(_head_kernel, num_layers, out_pads),
            out_shape=jax.ShapeDtypeStruct((b_pad, out_pads[-1]), out_dtype),
            grid=grid,
            in_specs=in_specs,
            out_specs=out_spec,
            compiler_params=params,
            cost_estimate=cost,
        )(x, *w_ops, b_pack)

    try:
        out_padded = _call(True)
    except Exception:
        # Fallback for toolchains where pipeline_mode=pl.Buffered(1) is rejected.
        out_padded = _call(False)

    # Slice off batch padding and padded logit columns (must happen before loss).
    return out_padded[:B, :output_size]


def cross_entropy_loss(logits, labels):
    """Glue: nn.CrossEntropyLoss equivalent (mean over batch), computed in f32."""
    logits = logits.astype(jnp.float32)
    lse = jax.nn.logsumexp(logits, axis=-1)
    picked = jnp.take_along_axis(logits, labels[:, None], axis=-1)[:, 0]
    return jnp.mean(lse - picked)


def init_params(key, num_layers, dim_emb, linear_hidden_size, output_size):
    """Deterministic synthetic parameters matching the PyTorch module's shapes."""
    if linear_hidden_size is None:
        linear_hidden_size = dim_emb
    if num_layers == 1:
        dims = [(dim_emb, output_size)]
    else:
        dims = [(dim_emb, linear_hidden_size)]
        dims += [(linear_hidden_size, linear_hidden_size)] * (num_layers - 2)
        dims += [(linear_hidden_size, output_size)]

    weights, biases = [], []
    for (fan_in, fan_out) in dims:
        key, kw, kb = jax.random.split(key, 3)
        bound = 1.0 / jnp.sqrt(fan_in)
        # stored as [in, out] so the kernel computes x @ W + b (== x @ W_torch.T + b)
        weights.append(jax.random.uniform(kw, (fan_in, fan_out), jnp.float32, -bound, bound))
        biases.append(jax.random.uniform(kb, (fan_out,), jnp.float32, -bound, bound))
    return weights, biases


if __name__ == "__main__":
    # Small, module-consistent shapes (batch / block_batch chosen so the grid has >1 step).
    batch = 48
    dim_emb = 32          # embedding dim of the encoder's pooled output
    hidden = 32           # linear_hidden_size
    output_size = 2       # number of classes
    num_layers = 3        # in -> hidden -> hidden -> out

    key = jax.random.PRNGKey(0)
    k_x, k_lbl, k_p = jax.random.split(key, 3)

    # encoder_outputs[1] == pooled [CLS] representation
    pooled = jax.random.normal(k_x, (batch, dim_emb), jnp.float32)
    labels = jax.random.randint(k_lbl, (batch,), 0, output_size, jnp.int32)

    weights, biases = init_params(k_p, num_layers, dim_emb, hidden, output_size)

    # Hoisted one-time padding/casting of parameters (out of the per-call hot path).
    prepared = prepare_head_params(weights, biases)

    # --- Pallas forward (block_batch=16 -> 3 grid steps at this toy batch) ---
    logits = n_feedforwards_head_logits(pooled, prepared, block_batch=16)
    loss = cross_entropy_loss(logits, labels)
    jax.block_until_ready((logits, loss))

    # --- pure-JAX reference check (same bf16 quantization as the kernel) ---
    # NOTE: intermediate activations are re-quantized to bf16 between layers (as in
    # the kernel); this deviates from fp32 nn.Linear but is matched here on purpose.
    wq = [w.astype(jnp.bfloat16).astype(jnp.float32) for w in weights]
    h = pooled.astype(jnp.bfloat16).astype(jnp.float32)
    for i in range(num_layers - 1):
        h = jnp.maximum(h @ wq[i] + biases[i], 0.0)
        h = h.astype(jnp.bfloat16).astype(jnp.float32)
    logits_ref = h @ wq[-1] + biases[-1]

    logits_f32 = logits.astype(jnp.float32)
    assert logits.shape == (batch, output_size)
    assert jnp.allclose(logits_f32, logits_ref, atol=2e-2, rtol=2e-2), "mismatch vs reference"
    assert jnp.isfinite(loss), "loss not finite"
    print("KERNEL_OK")
</pallas_src>

<mosaic_0001>
module attributes {stable_mosaic.version = 11 : i64} {
  func.func @_head_kernel(%arg0: i32, %arg1: memref<16x128xbf16, #tpu.memory_space<vmem>>, %arg2: memref<128x128xbf16, #tpu.memory_space<vmem>>, %arg3: memref<128x128xbf16, #tpu.memory_space<vmem>>, %arg4: memref<128x128xbf16, #tpu.memory_space<vmem>>, %arg5: memref<3x128xf32, #tpu.memory_space<vmem>>, %arg6: memref<16x128xbf16, #tpu.memory_space<vmem>>) attributes {dimension_semantics = [#tpu.dimension_semantics<parallel>], iteration_bounds = array<i64: 3>, scalar_prefetch = 0 : i64, scratch_operands = 0 : i64, tpu.core_type = #tpu.core_type<tc>, window_params = [{transform_indices = @transform_0, window_bounds = array<i64: 16, 128>}, {pipeline_mode = #tpu.pipeline_mode<synchronous>, transform_indices = @transform_1, window_bounds = array<i64: 128, 128>}, {pipeline_mode = #tpu.pipeline_mode<synchronous>, transform_indices = @transform_2, window_bounds = array<i64: 128, 128>}, {pipeline_mode = #tpu.pipeline_mode<synchronous>, transform_indices = @transform_3, window_bounds = array<i64: 128, 128>}, {pipeline_mode = #tpu.pipeline_mode<synchronous>, transform_indices = @transform_4, window_bounds = array<i64: 3, 128>}, {transform_indices = @transform_5, window_bounds = array<i64: 16, 128>}]} {
    %c0 = arith.constant 0 : index
    %c0_0 = arith.constant 0 : index
    %0 = vector.load %arg1[%c0, %c0_0] : memref<16x128xbf16, #tpu.memory_space<vmem>>, vector<16x128xbf16>
    %c0_1 = arith.constant 0 : index
    %c0_2 = arith.constant 0 : index
    %1 = vector.load %arg2[%c0_1, %c0_2] : memref<128x128xbf16, #tpu.memory_space<vmem>>, vector<128x128xbf16>
    %cst = arith.constant dense<0.000000e+00> : vector<16x128xf32>
    %2 = tpu.matmul %0, %1, %cst {dimension_numbers = #tpu.dot_dimension_numbers<[1], [0], [0], [1], [0, 0, 1, 1], [], []>} : vector<16x128xbf16>, vector<128x128xbf16>, vector<16x128xf32> -> vector<16x128xf32>
    %c0_3 = arith.constant 0 : index
    %c0_4 = arith.constant 0 : index
    %3 = vector.load %arg5[%c0_3, %c0_4] : memref<3x128xf32, #tpu.memory_space<vmem>>, vector<1x128xf32>
    %4 = vector.broadcast %3 : vector<1x128xf32> to vector<16x128xf32>
    %5 = arith.addf %2, %4 : vector<16x128xf32>
    %cst_5 = arith.constant 0.000000e+00 : f32
    %6 = vector.broadcast %cst_5 : f32 to vector<16x128xf32>
    %7 = arith.maximumf %5, %6 : vector<16x128xf32>
    %8 = arith.truncf %7 : vector<16x128xf32> to vector<16x128xbf16>
    %c0_6 = arith.constant 0 : index
    %c0_7 = arith.constant 0 : index
    %9 = vector.load %arg3[%c0_6, %c0_7] : memref<128x128xbf16, #tpu.memory_space<vmem>>, vector<128x128xbf16>
    %cst_8 = arith.constant dense<0.000000e+00> : vector<16x128xf32>
    %10 = tpu.matmul %8, %9, %cst_8 {dimension_numbers = #tpu.dot_dimension_numbers<[1], [0], [0], [1], [0, 0, 1, 1], [], []>} : vector<16x128xbf16>, vector<128x128xbf16>, vector<16x128xf32> -> vector<16x128xf32>
    %c1 = arith.constant 1 : index
    %c0_9 = arith.constant 0 : index
    %11 = vector.load %arg5[%c1, %c0_9] : memref<3x128xf32, #tpu.memory_space<vmem>>, vector<1x128xf32>
    %12 = vector.broadcast %11 : vector<1x128xf32> to vector<16x128xf32>
    %13 = arith.addf %10, %12 : vector<16x128xf32>
    %cst_10 = arith.constant 0.000000e+00 : f32
    %14 = vector.broadcast %cst_10 : f32 to vector<16x128xf32>
    %15 = arith.maximumf %13, %14 : vector<16x128xf32>
    %16 = arith.truncf %15 : vector<16x128xf32> to vector<16x128xbf16>
    %c0_11 = arith.constant 0 : index
    %c0_12 = arith.constant 0 : index
    %17 = vector.load %arg4[%c0_11, %c0_12] : memref<128x128xbf16, #tpu.memory_space<vmem>>, vector<128x128xbf16>
    %cst_13 = arith.constant dense<0.000000e+00> : vector<16x128xf32>
    %18 = tpu.matmul %16, %17, %cst_13 {dimension_numbers = #tpu.dot_dimension_numbers<[1], [0], [0], [1], [0, 0, 1, 1], [], []>} : vector<16x128xbf16>, vector<128x128xbf16>, vector<16x128xf32> -> vector<16x128xf32>
    %c2 = arith.constant 2 : index
    %c0_14 = arith.constant 0 : index
    %19 = vector.load %arg5[%c2, %c0_14] : memref<3x128xf32, #tpu.memory_space<vmem>>, vector<1x128xf32>
    %20 = vector.broadcast %19 : vector<1x128xf32> to vector<16x128xf32>
    %21 = arith.addf %18, %20 : vector<16x128xf32>
    %22 = arith.truncf %21 : vector<16x128xf32> to vector<16x128xbf16>
    %c0_15 = arith.constant 0 : index
    %c0_16 = arith.constant 0 : index
    %23 = vector.load %arg6[%c0_15, %c0_16] : memref<16x128xbf16, #tpu.memory_space<vmem>>, vector<16x128xbf16>
    tpu.vector_store %arg6[%c0_15, %c0_16], %22 {strides = array<i32>} : memref<16x128xbf16, #tpu.memory_space<vmem>>, vector<16x128xbf16>,
    return
  }
  func.func @transform_0(%arg0: i32) -> (i32, i32) {
    %c0_i32 = arith.constant 0 : i32
    %c0_i32_0 = arith.constant 0 : i32
    return %arg0, %c0_i32 : i32, i32
  }
  func.func @transform_1(%arg0: i32) -> (i32, i32) {
    %c0_i32 = arith.constant 0 : i32
    %c0_i32_0 = arith.constant 0 : i32
    %c0_i32_1 = arith.constant 0 : i32
    return %c0_i32, %c0_i32_0 : i32, i32
  }
  func.func @transform_2(%arg0: i32) -> (i32, i32) {
    %c0_i32 = arith.constant 0 : i32
    %c0_i32_0 = arith.constant 0 : i32
    %c0_i32_1 = arith.constant 0 : i32
    return %c0_i32, %c0_i32_0 : i32, i32
  }
  func.func @transform_3(%arg0: i32) -> (i32, i32) {
    %c0_i32 = arith.constant 0 : i32
    %c0_i32_0 = arith.constant 0 : i32
    %c0_i32_1 = arith.constant 0 : i32
    return %c0_i32, %c0_i32_0 : i32, i32
  }
  func.func @transform_4(%arg0: i32) -> (i32, i32) {
    %c0_i32 = arith.constant 0 : i32
    %c0_i32_0 = arith.constant 0 : i32
    %c0_i32_1 = arith.constant 0 : i32
    return %c0_i32, %c0_i32_0 : i32, i32
  }
  func.func @transform_5(%arg0: i32) -> (i32, i32) {
    %c0_i32 = arith.constant 0 : i32
    %c0_i32_0 = arith.constant 0 : i32
    return %arg0, %c0_i32 : i32, i32
  }
}

module attributes {stable_mosaic.version = 11 : i64} {
  func.func @_head_kernel(%arg0: i32, %arg1: memref<16x128xbf16, #tpu.memory_space<vmem>>, %arg2: memref<128x128xbf16, #tpu.memory_space<vmem>>, %arg3: memref<128x128xbf16, #tpu.memory_space<vmem>>, %arg4: memref<128x128xbf16, #tpu.memory_space<vmem>>, %arg5: memref<3x128xf32, #tpu.memory_space<vmem>>, %arg6: memref<16x128xbf16, #tpu.memory_space<vmem>>) attributes {dimension_semantics = [#tpu.dimension_semantics<parallel>], iteration_bounds = array<i64: 3>, scalar_prefetch = 0 : i64, scratch_operands = 0 : i64, tpu.core_type = #tpu.core_type<tc>, window_params = [{transform_indices = @transform_0, window_bounds = array<i64: 16, 128>}, {pipeline_mode = #tpu.pipeline_mode<synchronous>, transform_indices = @transform_1, window_bounds = array<i64: 128, 128>}, {pipeline_mode = #tpu.pipeline_mode<synchronous>, transform_indices = @transform_2, window_bounds = array<i64: 128, 128>}, {pipeline_mode = #tpu.pipeline_mode<synchronous>, transform_indices = @transform_3, window_bounds = array<i64: 128, 128>}, {pipeline_mode = #tpu.pipeline_mode<synchronous>, transform_indices = @transform_4, window_bounds = array<i64: 3, 128>}, {transform_indices = @transform_5, window_bounds = array<i64: 16, 128>}]} {
    %c0 = arith.constant 0 : index
    %c0_0 = arith.constant 0 : index
    %0 = vector.load %arg1[%c0, %c0_0] : memref<16x128xbf16, #tpu.memory_space<vmem>>, vector<16x128xbf16>
    %c0_1 = arith.constant 0 : index
    %c0_2 = arith.constant 0 : index
    %1 = vector.load %arg2[%c0_1, %c0_2] : memref<128x128xbf16, #tpu.memory_space<vmem>>, vector<128x128xbf16>
    %cst = arith.constant dense<0.000000e+00> : vector<16x128xf32>
    %2 = tpu.matmul %0, %1, %cst {dimension_numbers = #tpu.dot_dimension_numbers<[1], [0], [0], [1], [0, 0, 1, 1], [], []>} : vector<16x128xbf16>, vector<128x128xbf16>, vector<16x128xf32> -> vector<16x128xf32>
    %c0_3 = arith.constant 0 : index
    %c0_4 = arith.constant 0 : index
    %3 = vector.load %arg5[%c0_3, %c0_4] : memref<3x128xf32, #tpu.memory_space<vmem>>, vector<1x128xf32>
    %4 = vector.broadcast %3 : vector<1x128xf32> to vector<16x128xf32>
    %5 = arith.addf %2, %4 : vector<16x128xf32>
    %cst_5 = arith.constant 0.000000e+00 : f32
    %6 = vector.broadcast %cst_5 : f32 to vector<16x128xf32>
    %7 = arith.maximumf %5, %6 : vector<16x128xf32>
    %8 = arith.truncf %7 : vector<16x128xf32> to vector<16x128xbf16>
    %c0_6 = arith.constant 0 : index
    %c0_7 = arith.constant 0 : index
    %9 = vector.load %arg3[%c0_6, %c0_7] : memref<128x128xbf16, #tpu.memory_space<vmem>>, vector<128x128xbf16>
    %cst_8 = arith.constant dense<0.000000e+00> : vector<16x128xf32>
    %10 = tpu.matmul %8, %9, %cst_8 {dimension_numbers = #tpu.dot_dimension_numbers<[1], [0], [0], [1], [0, 0, 1, 1], [], []>} : vector<16x128xbf16>, vector<128x128xbf16>, vector<16x128xf32> -> vector<16x128xf32>
    %c1 = arith.constant 1 : index
    %c0_9 = arith.constant 0 : index
    %11 = vector.load %arg5[%c1, %c0_9] : memref<3x128xf32, #tpu.memory_space<vmem>>, vector<1x128xf32>
    %12 = vector.broadcast %11 : vector<1x128xf32> to vector<16x128xf32>
    %13 = arith.addf %10, %12 : vector<16x128xf32>
    %cst_10 = arith.constant 0.000000e+00 : f32
    %14 = vector.broadcast %cst_10 : f32 to vector<16x128xf32>
    %15 = arith.maximumf %13, %14 : vector<16x128xf32>
    %16 = arith.truncf %15 : vector<16x128xf32> to vector<16x128xbf16>
    %c0_11 = arith.constant 0 : index
    %c0_12 = arith.constant 0 : index
    %17 = vector.load %arg4[%c0_11, %c0_12] : memref<128x128xbf16, #tpu.memory_space<vmem>>, vector<128x128xbf16>
    %cst_13 = arith.constant dense<0.000000e+00> : vector<16x128xf32>
    %18 = tpu.matmul %16, %17, %cst_13 {dimension_numbers = #tpu.dot_dimension_numbers<[1], [0], [0], [1], [0, 0, 1, 1], [], []>} : vector<16x128xbf16>, vector<128x128xbf16>, vector<16x128xf32> -> vector<16x128xf32>
    %c2 = arith.constant 2 : index
    %c0_14 = arith.constant 0 : index
    %19 = vector.load %arg5[%c2, %c0_14] : memref<3x128xf32, #tpu.memory_space<vmem>>, vector<1x128xf32>
    %20 = vector.broadcast %19 : vector<1x128xf32> to vector<16x128xf32>
    %21 = arith.addf %18, %20 : vector<16x128xf32>
    %22 = arith.truncf %21 : vector<16x128xf32> to vector<16x128xbf16>
    %c0_15 = arith.constant 0 : index
    %c0_16 = arith.constant 0 : index
    %23 = vector.load %arg6[%c0_15, %c0_16] : memref<16x128xbf16, #tpu.memory_space<vmem>>, vector<16x128xbf16>
    tpu.vector_store %arg6[%c0_15, %c0_16], %22 {strides = array<i32>} : memref<16x128xbf16, #tpu.memory_space<vmem>>, vector<16x128xbf16>,
    return
  }
  func.func @transform_0(%arg0: i32) -> (i32, i32) {
    %c0_i32 = arith.constant 0 : i32
    %c0_i32_0 = arith.constant 0 : i32
    return %arg0, %c0_i32 : i32, i32
  }
  func.func @transform_1(%arg0: i32) -> (i32, i32) {
    %c0_i32 = arith.constant 0 : i32
    %c0_i32_0 = arith.constant 0 : i32
    %c0_i32_1 = arith.constant 0 : i32
    return %c0_i32, %c0_i32_0 : i32, i32
  }
  func.func @transform_2(%arg0: i32) -> (i32, i32) {
    %c0_i32 = arith.constant 0 : i32
    %c0_i32_0 = arith.constant 0 : i32
    %c0_i32_1 = arith.constant 0 : i32
    return %c0_i32, %c0_i32_0 : i32, i32
  }
  func.func @transform_3(%arg0: i32) -> (i32, i32) {
    %c0_i32 = arith.constant 0 : i32
    %c0_i32_0 = arith.constant 0 : i32
    %c0_i32_1 = arith.constant 0 : i32
    return %c0_i32, %c0_i32_0 : i32, i32
  }
  func.func @transform_4(%arg0: i32) -> (i32, i32) {
    %c0_i32 = arith.constant 0 : i32
    %c0_i32_0 = arith.constant 0 : i32
    %c0_i32_1 = arith.constant 0 : i32
    return %c0_i32, %c0_i32_0 : i32, i32
  }
  func.func @transform_5(%arg0: i32) -> (i32, i32) {
    %c0_i32 = arith.constant 0 : i32
    %c0_i32_0 = arith.constant 0 : i32
    return %arg0, %c0_i32 : i32, i32
  }
}

</mosaic_0001>

<bundles_post_ra>
// kernel: tpu_custom_call.1
= control target key start
LH: loop header
LB: loop body
LE: loop exit
PB: predicated region body
PF: predicated region fallthrough
CT: control target
= control target key end

     0   :  { %10 = vsyncpa [#allocation3], 0  ;;  %s1385_s0 = inlined_call_operand.hbm [shape: bf16[48,128], index: 0, kind: input, shape index: {}]   ;;  %s1386_s1 = inlined_call_operand.hbm [shape: bf16[128,128], index: 1, kind: input, shape index: {}]   ;;  %s1387_s2 = inlined_call_operand.hbm [shape: bf16[128,128], index: 2, kind: input, shape index: {}]   ;;  %s1388_s3 = inlined_call_operand.hbm [shape: bf16[128,128], index: 3, kind: input, shape index: {}]   ;;  %s1389_s4 = inlined_call_operand.hbm [shape: f32[3,128], index: 4, kind: input, shape index: {}]   ;;  %s1390_s5 = inlined_call_operand.hbm [shape: bf16[48,128], index: 5, kind: output, shape index: {}]  }
   0x1   :  { %12 = vsyncpa [#allocation3 + $0x1], 0 }
   0x2   :  { %13 = vsyncpa [#allocation6], 0 }
   0x3   :  { %14 = vsyncpa [#allocation9], 0 }
   0x4   :  { %15 = vsyncpa [#allocation4], 0 }
   0x5   :  { %17 = vsyncpa [#allocation4 + $0x1], 0  ;;  %s1208_s18 = smov 0   ;;  %s1210_s19 = smov 0  }
   0x6   :  { %s1212_s20 = smov 0   ;;  %s1214_s21 = smov 0  }
   0x7 LB: > { %s1229_s22 = sadd.s32 4294967295, %s1168_s21   ;;  %s696_s23 = sadd.s32 4294967294, %s1168_s21   ;;  %s1168_s21 = sphi %s1214_s21, %s1402_s21   ;;  %s1164_s20 = sphi %s1212_s20, %s1401_s20   ;;  %s1160_s19 = sphi %s1210_s19, %s1400_s19   ;;  %s1156_s18 = sphi %s1208_s18, %s1399_s18  }
   0x8   : > { %p43_p0 = scmp.ne.s32.totalorder %s1160_s19, %s1156_s18  ;;  %p44_p1 = scmp.eq.s32.totalorder %s1229_s22, 0 }
   0x9   : > { %p151_p2 = scmp.eq.s32.totalorder %s1229_s22, 2  ;;  %p157_p3 = scmp.eq.s32.totalorder %s696_s23, 2 }
   0xa   : > { %p1238_p4 = por %p44_p1, %p43_p0  ;;  %p697_p5 = scmp.ge.s32.totalorder %s1168_s21, 1 }
   0xb   : > { %p1243_p6 = por %p157_p3, %p43_p0  ;;  %p164_p7 = scmp.lt.s32.totalorder %s1168_s21, 4 }
   0xc   : > { %s175_s28 = sshll.u32 %s1386_s1, 4  ;;  %s1170_s30 = smov [#allocation5]   ;;  %s176_s28 = int_to_ptr.hbm [resolvable:$true] %s175_s28 }
   0xd   : > { %p1251_p8 = pnand %p697_p5, %p164_p7  ;;  %s177_s6 = sshll.u32 %s1170_s30, 4  ;;  %s178_s6 = int_to_ptr.vmem [resolvable:$true] %s177_s6 }
   0xe   : > { %s203_s10 = sshll.u32 %s1388_s3, 4  ;;  %s1391_s11 = smov 64   ;;  %s204_s10 = int_to_ptr.hbm [resolvable:$true] %s203_s10 }
   0xf   : > { %p870_p9 = pneg %p1251_p8  ;;  %s1172_s12 = smov 4  }
  0x10   : > { %s1173_s13 = smov [#allocation8]   ;;  %s189_s17 = sshll.u32 %s1387_s2, 4  ;;  %s190_s17 = int_to_ptr.hbm [resolvable:$true] %s189_s17 }
  0x11   : > { %p1259_p10 = pnand %p870_p9, %p44_p1  ;;  %s205_s14 = sshll.u32 %s1173_s13, 4  ;;  %s206_s14 = int_to_ptr.vmem [resolvable:$true] %s205_s14 }
  0x12   : > { %s218_s27 = sshll.u32 %s1389_s4, 4  ;;  %s1290_s9 = sadd.s32 1, %s1168_s21   ;;  %s219_s27 = int_to_ptr.hbm [resolvable:$true] %s218_s27 }
  0x13   : > { %873 = dma.hbm_to_vmem [thread:$0]  (!%p1259_p10), %s176_s28, 1024, %s178_s6, [#allocation6], %s1391_s11, %s1391_s11, %s1172_s12  }
  0x14   : > { %879 = dma.hbm_to_vmem [thread:$0]  (!%p1259_p10), %s204_s10, 1024, %s206_s14, [#allocation9], %s1391_s11, %s1391_s11, %s1172_s12  }
  0x15   : > { %s1174_s28 = smov [#allocation7]   ;;  %s1175_s6 = smov [#allocation10]  }
  0x16   : > { %s191_s30 = sshll.u32 %s1174_s28, 4  ;;  %s220_s8 = sshll.u32 %s1175_s6, 4  ;;  %s192_s30 = int_to_ptr.vmem [resolvable:$true] %s191_s30  ;;  %s221_s8 = int_to_ptr.vmem [resolvable:$true] %s220_s8 }
  0x17   : > { %876 = dma.hbm_to_vmem [thread:$0]  (!%p1259_p10), %s190_s17, 1024, %s192_s30, [#allocation6], %s1391_s11, %s1391_s11, %s1172_s12  }
  0x18   : > { %882 = dma.hbm_to_vmem [thread:$0]  (!%p1259_p10), %s219_s27, 64, %s221_s8, [#allocation9]  }
  0x19   : > { %s30_s10 = sadd.s32 1, %s1164_s20  ;;  %s27_s13 = ssub.s32 %s1168_s21, %s1290_s9 }
  0x1a   : > { %p37_p11 = scmp.ne.s32.totalorder %s1164_s20, %s1160_s19  ;;  %p28_p12 = scmp.eq.s32.totalorder %s27_s13, 0 }
  0x1b   : > { %p38_p13 = scmp.eq.s32.totalorder %s1168_s21, 0  ;;  %p895_p3 = scmp.lt.s32.totalorder %s1168_s21, 3 }
  0x1c   : > { %p1300_p0 = por %p151_p2, %p37_p11  ;;  %s231_s16 = sand.u32 1, %s1164_s20  }
  0x1d   : > { %s1306_s15 = scalar_select %p28_p12, %s1164_s20, %s30_s10  }
  0x1e   : > { %p39_p5 = por %p38_p13, %p37_p11  ;;  %s703_s7 = sshll.u32 %s231_s16, 3 }
  0x1f   : > { %s818_s17 = sshll.u32 %s1168_s21, 3  ;;  %s235_s28 = scalar_lea.vmem [#allocation2], %s703_s7 }
  0x20   : > { %s240_s27 = scalar_lea.hbm %s1385_s0, %s818_s17  ;;  %s243_s30 = sshll.u32 %s235_s28, 4  ;;  %s244_s30 = int_to_ptr.vmem [resolvable:$true] %s243_s30 }
  0x21   : > { %s241_s6 = sshll.u32 %s240_s27, 4  ;;  %p1313_p2 = pnand %p895_p3, %p39_p5  ;;  %s242_s6 = int_to_ptr.hbm [resolvable:$true] %s241_s6 }
  0x22   : > { %s232_s10 = scalar_lea.sflag [#allocation3], %s231_s16  ;;  %s1064_s13 = sshra.s32 %s242_s6, 4  ;;  %s1065_s13 = int_to_ptr.hbm [resolvable:$true] %s1064_s13 }
  0x23   : > { %s1066_s11 = scalar_lea.hbm %s1065_s13, 8  ;;  %p1068_p9 = pneg %p1313_p2 }
  0x24   : > { %p1067_p7 = scmp.ne.s32.totalorder %s1065_s13, %s1066_s11  ;;  %s1071_s23 = scalar_lea.hbm %s1385_s0, 24 }
  0x25   : > { %p1072_p12 = scmp.lt.s32.totalorder %s1065_s13, %s1385_s0  ;;  %p1073_p13 = scmp.lt.s32.totalorder %s1071_s23, %s1066_s11 }
  0x26   : > { %p1069_p10 = pnand %p1068_p9, %p1067_p7 }
  0x27   : > { %p1074_p3 = por %p1073_p13, %p1072_p12 }
  0x28   : > { %p1070_p11 = pneg %p1069_p10 }
  0x2a   : > { %p1075_p5 = pnand %p1074_p3, %p1070_p11 }
  0x2c   : > { %1078 = shalt.err (!%p1075_p5)
}
  0x2d   : > { %s1398_s16 = smov 64   ;;  %255 = sbr.rel (%p1251_p8) target bundleno = 515 (0x203), region = 40 }
  0x2e   : > { %886 = dma.hbm_to_vmem [thread:$0]  (!%p1313_p2), %s242_s6, 128, %s244_s30, %s232_s10, %s1398_s16, %s1398_s16, %s1172_s12  }
  0x2f   : > { %s1333_s28 = sand.u32 (!%p1251_p8), 1, %s1160_s19  }
  0x30   : > { %s707_s11 = sshll.u32 (!%p1251_p8), %s1333_s28, 3  ;;  %s258_s13 = scalar_lea.sflag (!%p1251_p8), [#allocation3], %s1333_s28 }
  0x31   : > { %s261_s17 = scalar_lea.vmem (!%p1251_p8), [#allocation2], %s707_s11 }
  0x32   : > { %1139 = dma.done.wait (%p1238_p4), %s258_s13, 128  }
  0x33   : > { %1141 = vsyncadd (%p1238_p4), %s258_s13, 4294967168 }
  0x34   : > { %1143 = dma.done.wait (%p44_p1), [#allocation6], 2048  }
  0x35   : > { %1145 = vsyncadd (%p44_p1), [#allocation6], 4294965248 }
  0x36   : > { %1147 = dma.done.wait (%p44_p1), [#allocation9], 1088  }
  0x37   : > { %1149 = vsyncadd (%p44_p1), [#allocation9], 4294966208  ;;  %v827_v0 = vld [vmem:[#allocation5 + $0x38] sm:$0xff]  ;;  %v826_v1 = vld [vmem:[#allocation5 + $0x30] sm:$0xff]  ;;  %s844_s24 = sshll.u32 %s1229_s22, 3  ;;  %s308_s6 = scalar_lea.vmem [#allocation11], %s707_s11 }
  0x38   : > { %385 = vmatpush.bf16.msra.mxu0 %v827_v0  ;;  %v835_v2 = vld [vmem:[#allocation7 + $0x38] sm:$0xff]  ;;  %v834_v3 = vld [vmem:[#allocation7 + $0x30] sm:$0xff]  ;;  %v825_v4 = vld [vmem:[#allocation5 + $0x28] sm:$0xff]  ;;  %s581_s30 = scalar_lea.hbm %s1390_s5, %s844_s24  ;;  %s582_s8 = sshll.u32 %s308_s6, 4  ;;  %s583_s8 = int_to_ptr.vmem [resolvable:$true] %s582_s8 }
  0x39   : > { %468 = vmatpush.bf16.msra.mxu1 %v835_v2  ;;  %v833_v5 = vld [vmem:[#allocation7 + $0x28] sm:$0xff]  ;;  %v824_v6 = vld [vmem:[#allocation5 + $0x20] sm:$0xff]  ;;  %v823_v8 = vld [vmem:[#allocation5 + $0x18] sm:$0xff]  ;;  %s584_s10 = sshll.u32 %s581_s30, 4  ;;  %s570_s7 = scalar_lea.sflag [#allocation4], %s1333_s28  ;;  %s585_s10 = int_to_ptr.hbm [resolvable:$true] %s584_s10 }
  0x3a   : > { %v832_v7 = vld [vmem:[#allocation7 + $0x20] sm:$0xff]  ;;  %v822_v9 = vld [vmem:[#allocation5 + $0x10] sm:$0xff]  ;;  %v821_v10 = vld [vmem:[#allocation5 + $0x8] sm:$0xff]  ;;  %s1108_s23 = sshra.s32 %s585_s10, 4  ;;  %s1114_s16 = scalar_lea.hbm %s1390_s5, 24  ;;  %s1109_s23 = int_to_ptr.hbm [resolvable:$true] %s1108_s23 }
  0x3b   : > { %v820_v11 = vld [vmem:[#allocation5] sm:$0xff]  ;;  %v819_v12 = vld [vmem:[%s261_s17] sm:$0xff]  ;;  %v829_v15 = vld [vmem:[#allocation7 + $0x8] sm:$0xff]  ;;  %s1110_s22 = scalar_lea.hbm %s1109_s23, 8  ;;  %p1115_p2 = scmp.lt.s32.totalorder %s1109_s23, %s1390_s5 }
  0x3c   : > { %386 = vmatpush.bf16.msra.mxu0 %v826_v1  ;;  %v831_v13 = vld [vmem:[#allocation7 + $0x18] sm:$0xff]  ;;  %v830_v14 = vld [vmem:[#allocation7 + $0x10] sm:$0xff]  ;;  %v828_v16 = vld [vmem:[#allocation7] sm:$0xff]  ;;  %p1111_p1 = scmp.ne.s32.totalorder %s1109_s23, %s1110_s22  ;;  %p1116_p7 = scmp.lt.s32.totalorder %s1114_s16, %s1110_s22 }
  0x3d   : > { %469 = vmatpush.bf16.msra.mxu1 %v834_v3  ;;  %v843_v17 = vld [vmem:[#allocation8 + $0x38] sm:$0xff]  ;;  %v842_v18 = vld [vmem:[#allocation8 + $0x30] sm:$0xff]  ;;  %v841_v19 = vld [vmem:[#allocation8 + $0x28] sm:$0xff] }
  0x3e   : > { %551 = vmatpush.bf16.msra.mxu2 %v843_v17  ;;  %v840_v20 = vld [vmem:[#allocation8 + $0x20] sm:$0xff]  ;;  %v839_v29 = vld [vmem:[#allocation8 + $0x18] sm:$0xff]  ;;  %v838_v30 = vld [vmem:[#allocation8 + $0x10] sm:$0xff]  ;;  %p1112_p4 = pnand %p1111_p1, %p1300_p0  ;;  %p1117_p9 = por %p1116_p7, %p1115_p2 }
  0x3f   : > { %v941_v22 = vld [vmem:[#allocation10] ss:$0 sm:$0xff]  ;;  %v837_v31 = vld [vmem:[#allocation8 + $0x8] sm:$0xff]  ;;  %v942_v34 = vld [vmem:[#allocation10 + $0x1] ss:$0 sm:$0xff] }
  0x40   : > { %387 = vmatpush.bf16.msra.mxu0 %v825_v4  ;;  %v836_v32 = vld [vmem:[#allocation8] sm:$0xff]  ;;  %p1113_p8 = pneg %p1112_p4 }
  0x41   : > { %470 = vmatpush.bf16.msra.mxu1 %v833_v5  ;;  %v943_v42 = vld [vmem:[#allocation10 + $0x2] ss:$0 sm:$0xff] }
  0x42   : > { %552 = vmatpush.bf16.msra.mxu2 %v842_v18  ;;  %p1118_p10 = pnand %p1117_p9, %p1113_p8 }
  0x44   : > { %388 = vmatpush.bf16.msra.mxu0 %v824_v6 }
  0x45   : > { %471 = vmatpush.bf16.msra.mxu1 %v832_v7 }
  0x46   : > { %553 = vmatpush.bf16.msra.mxu2 %v841_v19 }
  0x48   : > { %389 = vmatpush.bf16.msra.mxu0 %v823_v8 }
  0x49   : > { %472 = vmatpush.bf16.msra.mxu1 %v831_v13 }
  0x4a   : > { %554 = vmatpush.bf16.msra.mxu2 %v840_v20 }
  0x4c   : > { %390 = vmatpush.bf16.msra.mxu0 %v822_v9 }
  0x4d   : > { %473 = vmatpush.bf16.msra.mxu1 %v830_v14 }
  0x4e   : > { %555 = vmatpush.bf16.msra.mxu2 %v839_v29 }
  0x50   : > { %391 = vmatpush.bf16.msra.mxu0 %v821_v10 }
  0x51   : > { %474 = vmatpush.bf16.msra.mxu1 %v829_v15 }
  0x52   : > { %556 = vmatpush.bf16.msra.mxu2 %v838_v30 }
  0x54   : > { %392 = vmatpush.bf16.msra.mxu0 %v820_v11 }
  0x55   : > { %475 = vmatpush.bf16.msra.mxu1 %v828_v16 }
  0x56   : > { %557 = vmatpush.bf16.msra.mxu2 %v837_v31 }
  0x57   : > { %393 = vmatmul.bf16.vlgmr.msra.gmra.mxu0 %v819_v12 }
  0x5a   : > { %558 = vmatpush.bf16.msra.mxu2 %v836_v32 }
  0xd4   : > { %v394_v21 = vpop.f32.mrf.mxu0 }
  0xd5   : > { %v395_v23 = vadd.f32 %v941_v22, %v394_v21 }
  0xd7   : > { %v399_v26 = vmax.f32 %v395_v23, 0.0 }
  0xdc   : > { %v396_v24 = vpop.f32.mrf.mxu0 }
  0xdd   : > { %v397_v25 = vadd.f32 %v941_v22, %v396_v24 }
  0xdf   : > { %v400_v27 = vmax.f32 %v397_v25, 0.0 }
  0xe1   : > { %v401_v28 = vpack.c.bf16 %v400_v27, %v399_v26 }
  0xe3   : > { %476 = vmatmul.bf16.vlgmr.msra.gmra.mxu1 %v401_v28 }
 0x160   : > { %v477_v33 = vpop.f32.mrf.mxu1 }
 0x161   : > { %v478_v35 = vadd.f32 %v942_v34, %v477_v33 }
 0x163   : > { %v482_v38 = vmax.f32 %v478_v35, 0.0 }
 0x168   : > { %v479_v36 = vpop.f32.mrf.mxu1 }
 0x169   : > { %v480_v37 = vadd.f32 %v942_v34, %v479_v36 }
 0x16b   : > { %v483_v39 = vmax.f32 %v480_v37, 0.0 }
 0x16d   : > { %v484_v40 = vpack.c.bf16 %v483_v39, %v482_v38 }
 0x16f   : > { %559 = vmatmul.bf16.vlgmr.msra.gmra.mxu2 %v484_v40 }
 0x1f2   : > { %v560_v41 = vpop.f32.mrf.mxu2 }
 0x1f3   : > { %v561_v44 = vadd.f32 %v943_v42, %v560_v41 }
 0x1fa   : > { %v562_v43 = vpop.f32.mrf.mxu2 }
 0x1fb   : > { %v563_v45 = vadd.f32 %v943_v42, %v562_v43 }
 0x1fd   : > { %v848_v46 = vpack.c.bf16 %v563_v45, %v561_v44 }
 0x1ff   : > { %849 = vst [vmem:[%s308_s6] sm:$0xff] %v848_v46  }
 0x200   : > { %1121 = shalt.err (!%p1118_p10)
}
 0x201   : > { %s1176_s28 = smov 64   ;;  %s1177_s17 = smov 4  }
 0x202   : > { %868 = dma.vmem_to_hbm [thread:$0]  (%p1300_p0), %s583_s8, 128, %s585_s10, %s570_s7, %s1176_s28, %s1176_s28, %s1177_s17  }
 0x203 PF: > { %p900_p11 = scmp.ge.s32.totalorder %s1168_s21, 2  ;;  %s599_s24 = sand.u32 1, %s1156_s18  }
 0x204   : > { %s600_s29 = scalar_lea.sflag [#allocation4], %s599_s24 }
 0x205   : > { %p888_p12 = pnand %p900_p11, %p1243_p6 }
 0x207   : > { %p889_p13 = pneg %p888_p12 }
 0x209   : > { %1151 = dma.done.wait (%p889_p13), %s600_s29, 128  }
 0x20a   : > { %1153 = vsyncadd (%p889_p13), %s600_s29, 4294967168  ;;  %p20_p3 = scmp.ge.s32.totalorder %s1290_s9, 5   ;;  %s1399_s18 = smov %s1160_s19 }
 0x20b   : > { %s1400_s19 = smov %s1164_s20  ;;  %s1401_s20 = smov %s1306_s15 }
 0x20c   : > { %s1402_s21 = smov %s1290_s9  ;;  %22 = sbr.rel (!%p20_p3) target bundleno = 7 (0x7), region = 101 }
 0x211   :  { %606 = vsyncpa [#allocation3], 1 }
 0x212   :  { %608 = vsyncpa [#allocation3 + $0x1], 1 }
 0x213   :  { %609 = vsyncpa [#allocation6], 1 }
 0x214   :  { %610 = vsyncpa [#allocation9], 1 }
 0x215   :  { %611 = vsyncpa [#allocation4], 1 }
 0x216   :  { %613 = vsyncpa [#allocation4 + $0x1], 1 }

// kernel: tpu_custom_call.1
= control target key start
LH: loop header
LB: loop body
LE: loop exit
PB: predicated region body
PF: predicated region fallthrough
CT: control target
= control target key end

     0   :  { %10 = vsyncpa [#allocation3], 0  ;;  %s1385_s0 = inlined_call_operand.hbm [shape: bf16[48,128], index: 0, kind: input, shape index: {}]   ;;  %s1386_s1 = inlined_call_operand.hbm [shape: bf16[128,128], index: 1, kind: input, shape index: {}]   ;;  %s1387_s2 = inlined_call_operand.hbm [shape: bf16[128,128], index: 2, kind: input, shape index: {}]   ;;  %s1388_s3 = inlined_call_operand.hbm [shape: bf16[128,128], index: 3, kind: input, shape index: {}]   ;;  %s1389_s4 = inlined_call_operand.hbm [shape: f32[3,128], index: 4, kind: input, shape index: {}]   ;;  %s1390_s5 = inlined_call_operand.hbm [shape: bf16[48,128], index: 5, kind: output, shape index: {}]  }
   0x1   :  { %12 = vsyncpa [#allocation3 + $0x1], 0 }
   0x2   :  { %13 = vsyncpa [#allocation6], 0 }
   0x3   :  { %14 = vsyncpa [#allocation9], 0 }
   0x4   :  { %15 = vsyncpa [#allocation4], 0 }
   0x5   :  { %17 = vsyncpa [#allocation4 + $0x1], 0  ;;  %s1208_s18 = smov 0   ;;  %s1210_s19 = smov 0  }
   0x6   :  { %s1212_s20 = smov 0   ;;  %s1214_s21 = smov 0  }
   0x7 LB: > { %s1229_s22 = sadd.s32 4294967295, %s1168_s21   ;;  %s696_s23 = sadd.s32 4294967294, %s1168_s21   ;;  %s1168_s21 = sphi %s1214_s21, %s1402_s21   ;;  %s1164_s20 = sphi %s1212_s20, %s1401_s20   ;;  %s1160_s19 = sphi %s1210_s19, %s1400_s19   ;;  %s1156_s18 = sphi %s1208_s18, %s1399_s18  }
   0x8   : > { %p43_p0 = scmp.ne.s32.totalorder %s1160_s19, %s1156_s18  ;;  %p44_p1 = scmp.eq.s32.totalorder %s1229_s22, 0 }
   0x9   : > { %p151_p2 = scmp.eq.s32.totalorder %s1229_s22, 2  ;;  %p157_p3 = scmp.eq.s32.totalorder %s696_s23, 2 }
   0xa   : > { %p1238_p4 = por %p44_p1, %p43_p0  ;;  %p697_p5 = scmp.ge.s32.totalorder %s1168_s21, 1 }
   0xb   : > { %p1243_p6 = por %p157_p3, %p43_p0  ;;  %p164_p7 = scmp.lt.s32.totalorder %s1168_s21, 4 }
   0xc   : > { %s175_s28 = sshll.u32 %s1386_s1, 4  ;;  %s1170_s30 = smov [#allocation5]   ;;  %s176_s28 = int_to_ptr.hbm [resolvable:$true] %s175_s28 }
   0xd   : > { %p1251_p8 = pnand %p697_p5, %p164_p7  ;;  %s177_s6 = sshll.u32 %s1170_s30, 4  ;;  %s178_s6 = int_to_ptr.vmem [resolvable:$true] %s177_s6 }
   0xe   : > { %s203_s10 = sshll.u32 %s1388_s3, 4  ;;  %s1391_s11 = smov 64   ;;  %s204_s10 = int_to_ptr.hbm [resolvable:$true] %s203_s10 }
   0xf   : > { %p870_p9 = pneg %p1251_p8  ;;  %s1172_s12 = smov 4  }
  0x10   : > { %s1173_s13 = smov [#allocation8]   ;;  %s189_s17 = sshll.u32 %s1387_s2, 4  ;;  %s190_s17 = int_to_ptr.hbm [resolvable:$true] %s189_s17 }
  0x11   : > { %p1259_p10 = pnand %p870_p9, %p44_p1  ;;  %s205_s14 = sshll.u32 %s1173_s13, 4  ;;  %s206_s14 = int_to_ptr.vmem [resolvable:$true] %s205_s14 }
  0x12   : > { %s218_s27 = sshll.u32 %s1389_s4, 4  ;;  %s1290_s9 = sadd.s32 1, %s1168_s21   ;;  %s219_s27 = int_to_ptr.hbm [resolvable:$true] %s218_s27 }
  0x13   : > { %873 = dma.hbm_to_vmem [thread:$0]  (!%p1259_p10), %s176_s28, 1024, %s178_s6, [#allocation6], %s1391_s11, %s1391_s11, %s1172_s12  }
  0x14   : > { %879 = dma.hbm_to_vmem [thread:$0]  (!%p1259_p10), %s204_s10, 1024, %s206_s14, [#allocation9], %s1391_s11, %s1391_s11, %s1172_s12  }
  0x15   : > { %s1174_s28 = smov [#allocation7]   ;;  %s1175_s6 = smov [#allocation10]  }
  0x16   : > { %s191_s30 = sshll.u32 %s1174_s28, 4  ;;  %s220_s8 = sshll.u32 %s1175_s6, 4  ;;  %s192_s30 = int_to_ptr.vmem [resolvable:$true] %s191_s30  ;;  %s221_s8 = int_to_ptr.vmem [resolvable:$true] %s220_s8 }
  0x17   : > { %876 = dma.hbm_to_vmem [thread:$0]  (!%p1259_p10), %s190_s17, 1024, %s192_s30, [#allocation6], %s1391_s11, %s1391_s11, %s1172_s12  }
  0x18   : > { %882 = dma.hbm_to_vmem [thread:$0]  (!%p1259_p10), %s219_s27, 64, %s221_s8, [#allocation9]  }
  0x19   : > { %s30_s10 = sadd.s32 1, %s1164_s20  ;;  %s27_s13 = ssub.s32 %s1168_s21, %s1290_s9 }
  0x1a   : > { %p37_p11 = scmp.ne.s32.totalorder %s1164_s20, %s1160_s19  ;;  %p28_p12 = scmp.eq.s32.totalorder %s27_s13, 0 }
  0x1b   : > { %p38_p13 = scmp.eq.s32.totalorder %s1168_s21, 0  ;;  %p895_p3 = scmp.lt.s32.totalorder %s1168_s21, 3 }
  0x1c   : > { %p1300_p0 = por %p151_p2, %p37_p11  ;;  %s231_s16 = sand.u32 1, %s1164_s20  }
  0x1d   : > { %s1306_s15 = scalar_select %p28_p12, %s1164_s20, %s30_s10  }
  0x1e   : > { %p39_p5 = por %p38_p13, %p37_p11  ;;  %s703_s7 = sshll.u32 %s231_s16, 3 }
  0x1f   : > { %s818_s17 = sshll.u32 %s1168_s21, 3  ;;  %s235_s28 = scalar_lea.vmem [#allocation2], %s703_s7 }
  0x20   : > { %s240_s27 = scalar_lea.hbm %s1385_s0, %s818_s17  ;;  %s243_s30 = sshll.u32 %s235_s28, 4  ;;  %s244_s30 = int_to_ptr.vmem [resolvable:$true] %s243_s30 }
  0x21   : > { %s241_s6 = sshll.u32 %s240_s27, 4  ;;  %p1313_p2 = pnand %p895_p3, %p39_p5  ;;  %s242_s6 = int_to_ptr.hbm [resolvable:$true] %s241_s6 }
  0x22   : > { %s232_s10 = scalar_lea.sflag [#allocation3], %s231_s16  ;;  %s1064_s13 = sshra.s32 %s242_s6, 4  ;;  %s1065_s13 = int_to_ptr.hbm [resolvable:$true] %s1064_s13 }
  0x23   : > { %s1066_s11 = scalar_lea.hbm %s1065_s13, 8  ;;  %p1068_p9 = pneg %p1313_p2 }
  0x24   : > { %p1067_p7 = scmp.ne.s32.totalorder %s1065_s13, %s1066_s11  ;;  %s1071_s23 = scalar_lea.hbm %s1385_s0, 24 }
  0x25   : > { %p1072_p12 = scmp.lt.s32.totalorder %s1065_s13, %s1385_s0  ;;  %p1073_p13 = scmp.lt.s32.totalorder %s1071_s23, %s1066_s11 }
  0x26   : > { %p1069_p10 = pnand %p1068_p9, %p1067_p7 }
  0x27   : > { %p1074_p3 = por %p1073_p13, %p1072_p12 }
  0x28   : > { %p1070_p11 = pneg %p1069_p10 }
  0x2a   : > { %p1075_p5 = pnand %p1074_p3, %p1070_p11 }
  0x2c   : > { %1078 = shalt.err (!%p1075_p5)
}
  0x2d   : > { %s1398_s16 = smov 64   ;;  %255 = sbr.rel (%p1251_p8) target bundleno = 515 (0x203), region = 40 }
  0x2e   : > { %886 = dma.hbm_to_vmem [thread:$0]  (!%p1313_p2), %s242_s6, 128, %s244_s30, %s232_s10, %s1398_s16, %s1398_s16, %s1172_s12  }
  0x2f   : > { %s1333_s28 = sand.u32 (!%p1251_p8), 1, %s1160_s19  }
  0x30   : > { %s707_s11 = sshll.u32 (!%p1251_p8), %s1333_s28, 3  ;;  %s258_s13 = scalar_lea.sflag (!%p1251_p8), [#allocation3], %s1333_s28 }
  0x31   : > { %s261_s17 = scalar_lea.vmem (!%p1251_p8), [#allocation2], %s707_s11 }
  0x32   : > { %1139 = dma.done.wait (%p1238_p4), %s258_s13, 128  }
  0x33   : > { %1141 = vsyncadd (%p1238_p4), %s258_s13, 4294967168 }
  0x34   : > { %1143 = dma.done.wait (%p44_p1), [#allocation6], 2048  }
  0x35   : > { %1145 = vsyncadd (%p44_p1), [#allocation6], 4294965248 }
  0x36   : > { %1147 = dma.done.wait (%p44_p1), [#allocation9], 1088  }
  0x37   : > { %1149 = vsyncadd (%p44_p1), [#allocation9], 4294966208  ;;  %v827_v0 = vld [vmem:[#allocation5 + $0x38] sm:$0xff]  ;;  %v826_v1 = vld [vmem:[#allocation5 + $0x30] sm:$0xff]  ;;  %s844_s24 = sshll.u32 %s1229_s22, 3  ;;  %s308_s6 = scalar_lea.vmem [#allocation11], %s707_s11 }
  0x38   : > { %385 = vmatpush.bf16.msra.mxu0 %v827_v0  ;;  %v835_v2 = vld [vmem:[#allocation7 + $0x38] sm:$0xff]  ;;  %v834_v3 = vld [vmem:[#allocation7 + $0x30] sm:$0xff]  ;;  %v825_v4 = vld [vmem:[#allocation5 + $0x28] sm:$0xff]  ;;  %s581_s30 = scalar_lea.hbm %s1390_s5, %s844_s24  ;;  %s582_s8 = sshll.u32 %s308_s6, 4  ;;  %s583_s8 = int_to_ptr.vmem [resolvable:$true] %s582_s8 }
  0x39   : > { %468 = vmatpush.bf16.msra.mxu1 %v835_v2  ;;  %v833_v5 = vld [vmem:[#allocation7 + $0x28] sm:$0xff]  ;;  %v824_v6 = vld [vmem:[#allocation5 + $0x20] sm:$0xff]  ;;  %v823_v8 = vld [vmem:[#allocation5 + $0x18] sm:$0xff]  ;;  %s584_s10 = sshll.u32 %s581_s30, 4  ;;  %s570_s7 = scalar_lea.sflag [#allocation4], %s1333_s28  ;;  %s585_s10 = int_to_ptr.hbm [resolvable:$true] %s584_s10 }
  0x3a   : > { %v832_v7 = vld [vmem:[#allocation7 + $0x20] sm:$0xff]  ;;  %v822_v9 = vld [vmem:[#allocation5 + $0x10] sm:$0xff]  ;;  %v821_v10 = vld [vmem:[#allocation5 + $0x8] sm:$0xff]  ;;  %s1108_s23 = sshra.s32 %s585_s10, 4  ;;  %s1114_s16 = scalar_lea.hbm %s1390_s5, 24  ;;  %s1109_s23 = int_to_ptr.hbm [resolvable:$true] %s1108_s23 }
  0x3b   : > { %v820_v11 = vld [vmem:[#allocation5] sm:$0xff]  ;;  %v819_v12 = vld [vmem:[%s261_s17] sm:$0xff]  ;;  %v829_v15 = vld [vmem:[#allocation7 + $0x8] sm:$0xff]  ;;  %s1110_s22 = scalar_lea.hbm %s1109_s23, 8  ;;  %p1115_p2 = scmp.lt.s32.totalorder %s1109_s23, %s1390_s5 }
  0x3c   : > { %386 = vmatpush.bf16.msra.mxu0 %v826_v1  ;;  %v831_v13 = vld [vmem:[#allocation7 + $0x18] sm:$0xff]  ;;  %v830_v14 = vld [vmem:[#allocation7 + $0x10] sm:$0xff]  ;;  %v828_v16 = vld [vmem:[#allocation7] sm:$0xff]  ;;  %p1111_p1 = scmp.ne.s32.totalorder %s1109_s23, %s1110_s22  ;;  %p1116_p7 = scmp.lt.s32.totalorder %s1114_s16, %s1110_s22 }
  0x3d   : > { %469 = vmatpush.bf16.msra.mxu1 %v834_v3  ;;  %v843_v17 = vld [vmem:[#allocation8 + $0x38] sm:$0xff]  ;;  %v842_v18 = vld [vmem:[#allocation8 + $0x30] sm:$0xff]  ;;  %v841_v19 = vld [vmem:[#allocation8 + $0x28] sm:$0xff] }
  0x3e   : > { %551 = vmatpush.bf16.msra.mxu2 %v843_v17  ;;  %v840_v20 = vld [vmem:[#allocation8 + $0x20] sm:$0xff]  ;;  %v839_v29 = vld [vmem:[#allocation8 + $0x18] sm:$0xff]  ;;  %v838_v30 = vld [vmem:[#allocation8 + $0x10] sm:$0xff]  ;;  %p1112_p4 = pnand %p1111_p1, %p1300_p0  ;;  %p1117_p9 = por %p1116_p7, %p1115_p2 }
  0x3f   : > { %v941_v22 = vld [vmem:[#allocation10] ss:$0 sm:$0xff]  ;;  %v837_v31 = vld [vmem:[#allocation8 + $0x8] sm:$0xff]  ;;  %v942_v34 = vld [vmem:[#allocation10 + $0x1] ss:$0 sm:$0xff] }
  0x40   : > { %387 = vmatpush.bf16.msra.mxu0 %v825_v4  ;;  %v836_v32 = vld [vmem:[#allocation8] sm:$0xff]  ;;  %p1113_p8 = pneg %p1112_p4 }
  0x41   : > { %470 = vmatpush.bf16.msra.mxu1 %v833_v5  ;;  %v943_v42 = vld [vmem:[#allocation10 + $0x2] ss:$0 sm:$0xff] }
  0x42   : > { %552 = vmatpush.bf16.msra.mxu2 %v842_v18  ;;  %p1118_p10 = pnand %p1117_p9, %p1113_p8 }
  0x44   : > { %388 = vmatpush.bf16.msra.mxu0 %v824_v6 }
  0x45   : > { %471 = vmatpush.bf16.msra.mxu1 %v832_v7 }
  0x46   : > { %553 = vmatpush.bf16.msra.mxu2 %v841_v19 }
  0x48   : > { %389 = vmatpush.bf16.msra.mxu0 %v823_v8 }
  0x49   : > { %472 = vmatpush.bf16.msra.mxu1 %v831_v13 }
  0x4a   : > { %554 = vmatpush.bf16.msra.mxu2 %v840_v20 }
  0x4c   : > { %390 = vmatpush.bf16.msra.mxu0 %v822_v9 }
  0x4d   : > { %473 = vmatpush.bf16.msra.mxu1 %v830_v14 }
  0x4e   : > { %555 = vmatpush.bf16.msra.mxu2 %v839_v29 }
  0x50   : > { %391 = vmatpush.bf16.msra.mxu0 %v821_v10 }
  0x51   : > { %474 = vmatpush.bf16.msra.mxu1 %v829_v15 }
  0x52   : > { %556 = vmatpush.bf16.msra.mxu2 %v838_v30 }
  0x54   : > { %392 = vmatpush.bf16.msra.mxu0 %v820_v11 }
  0x55   : > { %475 = vmatpush.bf16.msra.mxu1 %v828_v16 }
  0x56   : > { %557 = vmatpush.bf16.msra.mxu2 %v837_v31 }
  0x57   : > { %393 = vmatmul.bf16.vlgmr.msra.gmra.mxu0 %v819_v12 }
  0x5a   : > { %558 = vmatpush.bf16.msra.mxu2 %v836_v32 }
  0xd4   : > { %v394_v21 = vpop.f32.mrf.mxu0 }
  0xd5   : > { %v395_v23 = vadd.f32 %v941_v22, %v394_v21 }
  0xd7   : > { %v399_v26 = vmax.f32 %v395_v23, 0.0 }
  0xdc   : > { %v396_v24 = vpop.f32.mrf.mxu0 }
  0xdd   : > { %v397_v25 = vadd.f32 %v941_v22, %v396_v24 }
  0xdf   : > { %v400_v27 = vmax.f32 %v397_v25, 0.0 }
  0xe1   : > { %v401_v28 = vpack.c.bf16 %v400_v27, %v399_v26 }
  0xe3   : > { %476 = vmatmul.bf16.vlgmr.msra.gmra.mxu1 %v401_v28 }
 0x160   : > { %v477_v33 = vpop.f32.mrf.mxu1 }
 0x161   : > { %v478_v35 = vadd.f32 %v942_v34, %v477_v33 }
 0x163   : > { %v482_v38 = vmax.f32 %v478_v35, 0.0 }
 0x168   : > { %v479_v36 = vpop.f32.mrf.mxu1 }
 0x169   : > { %v480_v37 = vadd.f32 %v942_v34, %v479_v36 }
 0x16b   : > { %v483_v39 = vmax.f32 %v480_v37, 0.0 }
 0x16d   : > { %v484_v40 = vpack.c.bf16 %v483_v39, %v482_v38 }
 0x16f   : > { %559 = vmatmul.bf16.vlgmr.msra.gmra.mxu2 %v484_v40 }
 0x1f2   : > { %v560_v41 = vpop.f32.mrf.mxu2 }
 0x1f3   : > { %v561_v44 = vadd.f32 %v943_v42, %v560_v41 }
 0x1fa   : > { %v562_v43 = vpop.f32.mrf.mxu2 }
 0x1fb   : > { %v563_v45 = vadd.f32 %v943_v42, %v562_v43 }
 0x1fd   : > { %v848_v46 = vpack.c.bf16 %v563_v45, %v561_v44 }
 0x1ff   : > { %849 = vst [vmem:[%s308_s6] sm:$0xff] %v848_v46  }
 0x200   : > { %1121 = shalt.err (!%p1118_p10)
}
 0x201   : > { %s1176_s28 = smov 64   ;;  %s1177_s17 = smov 4  }
 0x202   : > { %868 = dma.vmem_to_hbm [thread:$0]  (%p1300_p0), %s583_s8, 128, %s585_s10, %s570_s7, %s1176_s28, %s1176_s28, %s1177_s17  }
 0x203 PF: > { %p900_p11 = scmp.ge.s32.totalorder %s1168_s21, 2  ;;  %s599_s24 = sand.u32 1, %s1156_s18  }
 0x204   : > { %s600_s29 = scalar_lea.sflag [#allocation4], %s599_s24 }
 0x205   : > { %p888_p12 = pnand %p900_p11, %p1243_p6 }
 0x207   : > { %p889_p13 = pneg %p888_p12 }
 0x209   : > { %1151 = dma.done.wait (%p889_p13), %s600_s29, 128  }
 0x20a   : > { %1153 = vsyncadd (%p889_p13), %s600_s29, 4294967168  ;;  %p20_p3 = scmp.ge.s32.totalorder %s1290_s9, 5   ;;  %s1399_s18 = smov %s1160_s19 }
 0x20b   : > { %s1400_s19 = smov %s1164_s20  ;;  %s1401_s20 = smov %s1306_s15 }
 0x20c   : > { %s1402_s21 = smov %s1290_s9  ;;  %22 = sbr.rel (!%p20_p3) target bundleno = 7 (0x7), region = 101 }
 0x211   :  { %606 = vsyncpa [#allocation3], 1 }
 0x212   :  { %608 = vsyncpa [#allocation3 + $0x1], 1 }
 0x213   :  { %609 = vsyncpa [#allocation6], 1 }
 0x214   :  { %610 = vsyncpa [#allocation9], 1 }
 0x215   :  { %611 = vsyncpa [#allocation4], 1 }
 0x216   :  { %613 = vsyncpa [#allocation4 + $0x1], 1 }

</bundles_post_ra>
